<compile_context>
chip_gen: v6e
topology: v6e:2x2x1
jax: 0.10.0
libtpu: 0.0.40
codegen_flags: <defaults>
</compile_context>

<pallas_src>
import math
import functools

import jax
import jax.numpy as jnp
from jax import lax
from jax.experimental import pallas as pl
from jax.experimental.pallas import tpu as pltpu


# ---------------------------------------------------------------------------
# Fused ResidualBlock kernel (one batch element per grid step)
# ---------------------------------------------------------------------------
def _residual_block_kernel(
    x_ref, xl_ref, xr_ref, cond_ref, diff_ref,
    wd_ref, bd_ref, wdil_ref, bdil_ref,
    wcond_ref, bcond_ref, wout_ref, bout_ref,
    res_ref, skip_ref, *, dilation, n_channels):
  f32 = jnp.float32
  C = n_channels

  x = x_ref[0]                       # (C, T)  current batch element
  x_left = xl_ref[0]                 # (C, T)  x[:, t - dilation], zero filled
  x_right = xr_ref[0]                # (C, T)  x[:, t + dilation], zero filled
  cond = cond_ref[0]                 # (E, T)
  diff = diff_ref[0]                 # (1, C)  diffusion-step embedding (row)
  T = x.shape[-1]

  # diffusion_projection: Linear(C, C) on the step embedding -> column (C, 1).
  # (multiply + lane-reduce == W @ d with no in-kernel transpose)
  d = jnp.sum(wd_ref[...] * diff, axis=1, keepdims=True) + bd_ref[...]    # (C, 1)

  # y = x + d, plus its two zero-padded time shifts (d added only where in-range,
  # so the conv's implicit zero padding is preserved exactly).
  t_idx = lax.broadcasted_iota(jnp.int32, (1, T), 1)
  m_left = (t_idx >= dilation).astype(f32)        # position t reads y[t - dilation]
  m_right = (t_idx < T - dilation).astype(f32)    # position t reads y[t + dilation]
  y_mid = x + d
  y_left = x_left + d * m_left
  y_right = x_right + d * m_right

  # dilated_conv: Conv1d(C, 2C, k=3, dilation, padding=dilation) == 3 MXU matmuls.
  acc = jnp.dot(wdil_ref[0], y_left, preferred_element_type=f32)
  acc += jnp.dot(wdil_ref[1], y_mid, preferred_element_type=f32)
  acc += jnp.dot(wdil_ref[2], y_right, preferred_element_type=f32)
  acc += bdil_ref[...]

  # conditioner_projection: Conv1d(E, 2C, k=1) == matmul.
  acc += jnp.dot(wcond_ref[...], cond, preferred_element_type=f32) + bcond_ref[...]

  # gated activation: sigmoid(gate) * tanh(filter)   (EUP ops, free VLIW slot)
  gate = acc[:C, :]
  filt = acc[C:, :]
  z = jax.nn.sigmoid(gate) * jnp.tanh(filt)

  # output_projection: Conv1d(C, 2C, k=1) == matmul; split into residual / skip.
  out = jnp.dot(wout_ref[...], z, preferred_element_type=f32) + bout_ref[...]
  residual = out[:C, :]
  skip = out[C:, :]

  inv_sqrt2 = 1.0 / math.sqrt(2.0)
  res_ref[0] = ((x + residual) * inv_sqrt2).astype(res_ref.dtype)
  skip_ref[0] = skip.astype(skip_ref.dtype)


# ---------------------------------------------------------------------------
# Wrapper
# ---------------------------------------------------------------------------
def residual_block_forward(params, x, conditioner, diffusion_step, *, dilation):
  """x: (B, C, T), conditioner: (B, E, T), diffusion_step: (B, C) -> (residual, skip)."""
  B, C, T = x.shape
  E = conditioner.shape[1]
  C2 = 2 * C
  assert 1 <= dilation < T

  # Zero-filled time shifts of x (built once by XLA; layout plumbing, not compute).
  zpad = jnp.zeros((B, C, dilation), x.dtype)
  x_left = jnp.concatenate([zpad, x[:, :, : T - dilation]], axis=-1)   # -> x[t - dil]
  x_right = jnp.concatenate([x[:, :, dilation:], zpad], axis=-1)       # -> x[t + dil]

  # Reshape/transpose weights once into matmul-friendly shapes (PyTorch (out, in, k)).
  w_diff = params["diffusion_projection.weight"]                       # (C, C)
  b_diff = params["diffusion_projection.bias"].reshape(C, 1)
  w_dil = jnp.transpose(params["dilated_conv.weight"], (2, 0, 1))      # (3, 2C, C)
  b_dil = params["dilated_conv.bias"].reshape(C2, 1)
  w_cond = params["conditioner_projection.weight"].reshape(C2, E)
  b_cond = params["conditioner_projection.bias"].reshape(C2, 1)
  w_out = params["output_projection.weight"].reshape(C2, C)
  b_out = params["output_projection.bias"].reshape(C2, 1)

  diff_row = diffusion_step.reshape(B, 1, C)

  kern = functools.partial(_residual_block_kernel, dilation=dilation, n_channels=C)

  act_spec = pl.BlockSpec((1, C, T), lambda b: (b, 0, 0))
  cond_spec = pl.BlockSpec((1, E, T), lambda b: (b, 0, 0))
  diff_spec = pl.BlockSpec((1, 1, C), lambda b: (b, 0, 0))
  w2 = lambda r, c: pl.BlockSpec((r, c), lambda b: (0, 0))      # weights: loaded once
  w3 = lambda s: pl.BlockSpec(s, lambda b: (0, 0, 0))

  res, skip = pl.pallas_call(
      kern,
      out_shape=(jax.ShapeDtypeStruct((B, C, T), x.dtype),
                 jax.ShapeDtypeStruct((B, C, T), x.dtype)),
      grid_spec=pltpu.PrefetchScalarGridSpec(
          num_scalar_prefetch=0,
          grid=(B,),
          in_specs=[
              act_spec, act_spec, act_spec, cond_spec, diff_spec,
              w2(C, C), w2(C, 1),
              w3((3, C2, C)), w2(C2, 1),
              w2(C2, E), w2(C2, 1),
              w2(C2, C), w2(C2, 1),
          ],
          out_specs=[act_spec, act_spec],
      ),
      compiler_params=pltpu.CompilerParams(
          dimension_semantics=("parallel",)),
  )(x, x_left, x_right, conditioner, diff_row,
    w_diff, b_diff, w_dil, b_dil, w_cond, b_cond, w_out, b_out)
  # TODO(synk): for very long T on v7x (64 MiB VMEM), add a T-tiled grid axis with halo
  # handling for the dilated conv; one batch element per step is sufficient at TTS sizes.
  return res, skip


# ---------------------------------------------------------------------------
# Pure-JAX reference for verification
# ---------------------------------------------------------------------------
def _conv1d_ref(x, w, b, *, dilation=1, padding=0):
  out = lax.conv_general_dilated(
      x, w, window_strides=(1,), padding=[(padding, padding)],
      rhs_dilation=(dilation,), dimension_numbers=("NCH", "OIH", "NCH"))
  return out + b[None, :, None]


def reference_residual_block(params, x, conditioner, diffusion_step, *, dilation):
  d = diffusion_step @ params["diffusion_projection.weight"].T \
      + params["diffusion_projection.bias"]
  y = x + d[:, :, None]
  y = _conv1d_ref(y, params["dilated_conv.weight"], params["dilated_conv.bias"],
                  dilation=dilation, padding=dilation)
  y = y + _conv1d_ref(conditioner, params["conditioner_projection.weight"],
                      params["conditioner_projection.bias"])
  gate, filt = jnp.split(y, 2, axis=1)
  y = jax.nn.sigmoid(gate) * jnp.tanh(filt)
  y = _conv1d_ref(y, params["output_projection.weight"],
                  params["output_projection.bias"])
  residual, skip = jnp.split(y, 2, axis=1)
  return (x + residual) / math.sqrt(2.0), skip


if __name__ == "__main__":
  jax.config.update("jax_default_matmul_precision", "highest")

  # Small shapes consistent with the module: residual_channels=8, encoder_hidden=16,
  # T=128 frames (lane-dense), dilation=2, batch=2.
  B, C, E, T, dilation = 2, 8, 16, 128, 2

  key = jax.random.PRNGKey(0)
  ks = jax.random.split(key, 11)

  def nrm(k, shape, scale):
    return scale * jax.random.normal(k, shape, jnp.float32)

  params = {
      "dilated_conv.weight": nrm(ks[0], (2 * C, C, 3), math.sqrt(2.0 / (C * 3))),
      "dilated_conv.bias": nrm(ks[1], (2 * C,), 0.1),
      "diffusion_projection.weight": nrm(ks[2], (C, C), 1.0 / math.sqrt(C)),
      "diffusion_projection.bias": nrm(ks[3], (C,), 0.1),
      "conditioner_projection.weight": nrm(ks[4], (2 * C, E, 1), 1.0 / math.sqrt(E)),
      "conditioner_projection.bias": nrm(ks[5], (2 * C,), 0.1),
      "output_projection.weight": nrm(ks[6], (2 * C, C, 1), 1.0 / math.sqrt(C)),
      "output_projection.bias": nrm(ks[7], (2 * C,), 0.1),
  }

  x = jax.random.normal(ks[8], (B, C, T), jnp.float32)
  conditioner = jax.random.normal(ks[9], (B, E, T), jnp.float32)
  diffusion_step = jax.random.normal(ks[10], (B, C), jnp.float32)

  fwd = jax.jit(functools.partial(residual_block_forward, dilation=dilation))
  res, skip = fwd(params, x, conditioner, diffusion_step)
  res, skip = jax.block_until_ready((res, skip))

  res_ref, skip_ref = reference_residual_block(
      params, x, conditioner, diffusion_step, dilation=dilation)

  assert res.shape == (B, C, T) and skip.shape == (B, C, T)
  err_r = float(jnp.max(jnp.abs(res - res_ref)))
  err_s = float(jnp.max(jnp.abs(skip - skip_ref)))
  assert err_r < 2e-3 and err_s < 2e-3, (err_r, err_s)

  print("KERNEL_OK")
</pallas_src>

<mosaic_0001>
module attributes {stable_mosaic.version = 11 : i64} {
  func.func @_residual_block_kernel(%arg0: i32, %arg1: memref<1x8x128xf32, #tpu.memory_space<vmem>>, %arg2: memref<1x8x128xf32, #tpu.memory_space<vmem>>, %arg3: memref<1x8x128xf32, #tpu.memory_space<vmem>>, %arg4: memref<1x16x128xf32, #tpu.memory_space<vmem>>, %arg5: memref<1x1x8xf32, #tpu.memory_space<vmem>>, %arg6: memref<8x8xf32, #tpu.memory_space<vmem>>, %arg7: memref<8x1xf32, #tpu.memory_space<vmem>>, %arg8: memref<3x16x8xf32, #tpu.memory_space<vmem>>, %arg9: memref<16x1xf32, #tpu.memory_space<vmem>>, %arg10: memref<16x16xf32, #tpu.memory_space<vmem>>, %arg11: memref<16x1xf32, #tpu.memory_space<vmem>>, %arg12: memref<16x8xf32, #tpu.memory_space<vmem>>, %arg13: memref<16x1xf32, #tpu.memory_space<vmem>>, %arg14: memref<1x8x128xf32, #tpu.memory_space<vmem>>, %arg15: memref<1x8x128xf32, #tpu.memory_space<vmem>>) attributes {dimension_semantics = [#tpu.dimension_semantics<parallel>], iteration_bounds = array<i64: 2>, scalar_prefetch = 0 : i64, scratch_operands = 0 : i64, tpu.core_type = #tpu.core_type<tc>, window_params = [{transform_indices = @transform_0, window_bounds = array<i64: 1, 8, 128>}, {transform_indices = @transform_1, window_bounds = array<i64: 1, 8, 128>}, {transform_indices = @transform_2, window_bounds = array<i64: 1, 8, 128>}, {transform_indices = @transform_3, window_bounds = array<i64: 1, 16, 128>}, {transform_indices = @transform_4, window_bounds = array<i64: 1, 1, 8>}, {pipeline_mode = #tpu.pipeline_mode<synchronous>, transform_indices = @transform_5, window_bounds = array<i64: 8, 8>}, {pipeline_mode = #tpu.pipeline_mode<synchronous>, transform_indices = @transform_6, window_bounds = array<i64: 8, 1>}, {pipeline_mode = #tpu.pipeline_mode<synchronous>, transform_indices = @transform_7, window_bounds = array<i64: 3, 16, 8>}, {pipeline_mode = #tpu.pipeline_mode<synchronous>, transform_indices = @transform_8, window_bounds = array<i64: 16, 1>}, {pipeline_mode = #tpu.pipeline_mode<synchronous>, transform_indices = @transform_9, window_bounds = array<i64: 16, 16>}, {pipeline_mode = #tpu.pipeline_mode<synchronous>, transform_indices = @transform_10, window_bounds = array<i64: 16, 1>}, {pipeline_mode = #tpu.pipeline_mode<synchronous>, transform_indices = @transform_11, window_bounds = array<i64: 16, 8>}, {pipeline_mode = #tpu.pipeline_mode<synchronous>, transform_indices = @transform_12, window_bounds = array<i64: 16, 1>}, {transform_indices = @transform_13, window_bounds = array<i64: 1, 8, 128>}, {transform_indices = @transform_14, window_bounds = array<i64: 1, 8, 128>}]} {
    %c0 = arith.constant 0 : index
    %c0_0 = arith.constant 0 : index
    %c0_1 = arith.constant 0 : index
    %0 = vector.load %arg1[%c0, %c0_0, %c0_1] : memref<1x8x128xf32, #tpu.memory_space<vmem>>, vector<1x8x128xf32>
    %1 = vector.shape_cast %0 : vector<1x8x128xf32> to vector<8x128xf32>
    %c0_2 = arith.constant 0 : index
    %c0_3 = arith.constant 0 : index
    %c0_4 = arith.constant 0 : index
    %2 = vector.load %arg2[%c0_2, %c0_3, %c0_4] : memref<1x8x128xf32, #tpu.memory_space<vmem>>, vector<1x8x128xf32>
    %3 = vector.shape_cast %2 : vector<1x8x128xf32> to vector<8x128xf32>
    %c0_5 = arith.constant 0 : index
    %c0_6 = arith.constant 0 : index
    %c0_7 = arith.constant 0 : index
    %4 = vector.load %arg3[%c0_5, %c0_6, %c0_7] : memref<1x8x128xf32, #tpu.memory_space<vmem>>, vector<1x8x128xf32>
    %5 = vector.shape_cast %4 : vector<1x8x128xf32> to vector<8x128xf32>
    %c0_8 = arith.constant 0 : index
    %c0_9 = arith.constant 0 : index
    %c0_10 = arith.constant 0 : index
    %6 = vector.load %arg4[%c0_8, %c0_9, %c0_10] : memref<1x16x128xf32, #tpu.memory_space<vmem>>, vector<1x16x128xf32>
    %7 = vector.shape_cast %6 : vector<1x16x128xf32> to vector<16x128xf32>
    %c0_11 = arith.constant 0 : index
    %c0_12 = arith.constant 0 : index
    %c0_13 = arith.constant 0 : index
    %8 = vector.load %arg5[%c0_11, %c0_12, %c0_13] : memref<1x1x8xf32, #tpu.memory_space<vmem>>, vector<1x1x8xf32>
    %9 = vector.shape_cast %8 : vector<1x1x8xf32> to vector<1x8xf32>
    %c0_14 = arith.constant 0 : index
    %c0_15 = arith.constant 0 : index
    %10 = vector.load %arg6[%c0_14, %c0_15] : memref<8x8xf32, #tpu.memory_space<vmem>>, vector<8x8xf32>
    %11 = vector.broadcast %9 : vector<1x8xf32> to vector<8x8xf32>
    %12 = arith.mulf %10, %11 : vector<8x8xf32>
    %cst = arith.constant dense<0.000000e+00> : vector<8xf32>
    %13 = vector.multi_reduction <add>, %12, %cst [1] : vector<8x8xf32> to vector<8xf32>
    %14 = vector.shape_cast %13 : vector<8xf32> to vector<8x1xf32>
    %c0_16 = arith.constant 0 : index
    %c0_17 = arith.constant 0 : index
    %15 = vector.load %arg7[%c0_16, %c0_17] : memref<8x1xf32, #tpu.memory_space<vmem>>, vector<8x1xf32>
    %16 = arith.addf %14, %15 : vector<8x1xf32>
    %17 = tpu.iota {dimensions = array<i32: 1>} : vector<1x128xi32>
    %c2_i32 = arith.constant 2 : i32
    %18 = vector.broadcast %c2_i32 : i32 to vector<1x128xi32>
    %19 = arith.cmpi sge, %17, %18 : vector<1x128xi32>
    %20 = arith.extui %19 : vector<1x128xi1> to vector<1x128xi32>
    %21 = arith.sitofp %20 : vector<1x128xi32> to vector<1x128xf32>
    %c126_i32 = arith.constant 126 : i32
    %22 = vector.broadcast %c126_i32 : i32 to vector<1x128xi32>
    %23 = arith.cmpi slt, %17, %22 : vector<1x128xi32>
    %24 = arith.extui %23 : vector<1x128xi1> to vector<1x128xi32>
    %25 = arith.sitofp %24 : vector<1x128xi32> to vector<1x128xf32>
    %26 = vector.broadcast %16 : vector<8x1xf32> to vector<8x128xf32>
    %27 = arith.addf %1, %26 : vector<8x128xf32>
    %28 = vector.broadcast %16 : vector<8x1xf32> to vector<8x128xf32>
    %29 = vector.broadcast %21 : vector<1x128xf32> to vector<8x128xf32>
    %30 = arith.mulf %28, %29 : vector<8x128xf32>
    %31 = arith.addf %3, %30 : vector<8x128xf32>
    %32 = vector.broadcast %16 : vector<8x1xf32> to vector<8x128xf32>
    %33 = vector.broadcast %25 : vector<1x128xf32> to vector<8x128xf32>
    %34 = arith.mulf %32, %33 : vector<8x128xf32>
    %35 = arith.addf %5, %34 : vector<8x128xf32>
    %c0_18 = arith.constant 0 : index
    %c0_19 = arith.constant 0 : index
    %c0_20 = arith.constant 0 : index
    %36 = vector.load %arg8[%c0_18, %c0_19, %c0_20] : memref<3x16x8xf32, #tpu.memory_space<vmem>>, vector<1x16x8xf32>
    %37 = vector.shape_cast %36 : vector<1x16x8xf32> to vector<16x8xf32>
    %cst_21 = arith.constant dense<0.000000e+00> : vector<16x128xf32>
    %38 = tpu.matmul %37, %31, %cst_21 {dimension_numbers = #tpu.dot_dimension_numbers<[1], [0], [0], [1], [0, 0, 1, 1], [], []>, precision = #tpu.contract_precision<fp32>} : vector<16x8xf32>, vector<8x128xf32>, vector<16x128xf32> -> vector<16x128xf32>
    %c1 = arith.constant 1 : index
    %c0_22 = arith.constant 0 : index
    %c0_23 = arith.constant 0 : index
    %39 = vector.load %arg8[%c1, %c0_22, %c0_23] : memref<3x16x8xf32, #tpu.memory_space<vmem>>, vector<1x16x8xf32>
    %40 = vector.shape_cast %39 : vector<1x16x8xf32> to vector<16x8xf32>
    %cst_24 = arith.constant dense<0.000000e+00> : vector<16x128xf32>
    %41 = tpu.matmul %40, %27, %cst_24 {dimension_numbers = #tpu.dot_dimension_numbers<[1], [0], [0], [1], [0, 0, 1, 1], [], []>, precision = #tpu.contract_precision<fp32>} : vector<16x8xf32>, vector<8x128xf32>, vector<16x128xf32> -> vector<16x128xf32>
    %42 = arith.addf %38, %41 : vector<16x128xf32>
    %c2 = arith.constant 2 : index
    %c0_25 = arith.constant 0 : index
    %c0_26 = arith.constant 0 : index
    %43 = vector.load %arg8[%c2, %c0_25, %c0_26] : memref<3x16x8xf32, #tpu.memory_space<vmem>>, vector<1x16x8xf32>
    %44 = vector.shape_cast %43 : vector<1x16x8xf32> to vector<16x8xf32>
    %cst_27 = arith.constant dense<0.000000e+00> : vector<16x128xf32>
    %45 = tpu.matmul %44, %35, %cst_27 {dimension_numbers = #tpu.dot_dimension_numbers<[1], [0], [0], [1], [0, 0, 1, 1], [], []>, precision = #tpu.contract_precision<fp32>} : vector<16x8xf32>, vector<8x128xf32>, vector<16x128xf32> -> vector<16x128xf32>
    %46 = arith.addf %42, %45 : vector<16x128xf32>
    %c0_28 = arith.constant 0 : index
    %c0_29 = arith.constant 0 : index
    %47 = vector.load %arg9[%c0_28, %c0_29] : memref<16x1xf32, #tpu.memory_space<vmem>>, vector<16x1xf32>
    %48 = vector.broadcast %47 : vector<16x1xf32> to vector<16x128xf32>
    %49 = arith.addf %46, %48 : vector<16x128xf32>
    %c0_30 = arith.constant 0 : index
    %c0_31 = arith.constant 0 : index
    %50 = vector.load %arg10[%c0_30, %c0_31] : memref<16x16xf32, #tpu.memory_space<vmem>>, vector<16x16xf32>
    %cst_32 = arith.constant dense<0.000000e+00> : vector<16x128xf32>
    %51 = tpu.matmul %50, %7, %cst_32 {dimension_numbers = #tpu.dot_dimension_numbers<[1], [0], [0], [1], [0, 0, 1, 1], [], []>, precision = #tpu.contract_precision<fp32>} : vector<16x16xf32>, vector<16x128xf32>, vector<16x128xf32> -> vector<16x128xf32>
    %c0_33 = arith.constant 0 : index
    %c0_34 = arith.constant 0 : index
    %52 = vector.load %arg11[%c0_33, %c0_34] : memref<16x1xf32, #tpu.memory_space<vmem>>, vector<16x1xf32>
    %53 = vector.broadcast %52 : vector<16x1xf32> to vector<16x128xf32>
    %54 = arith.addf %51, %53 : vector<16x128xf32>
    %55 = arith.addf %49, %54 : vector<16x128xf32>
    %56 = vector.extract_strided_slice %55 {offsets = [0, 0], sizes = [8, 128], strides = [1, 1]} : vector<16x128xf32> to vector<8x128xf32>
    %57 = vector.extract_strided_slice %55 {offsets = [8, 0], sizes = [8, 128], strides = [1, 1]} : vector<16x128xf32> to vector<8x128xf32>
    %58 = arith.negf %56 : vector<8x128xf32>
    %59 = math.exp %58 : vector<8x128xf32>
    %cst_35 = arith.constant 1.000000e+00 : f32
    %60 = vector.broadcast %cst_35 : f32 to vector<8x128xf32>
    %61 = arith.addf %60, %59 : vector<8x128xf32>
    %62 = arith.divf %60, %61 : vector<8x128xf32>
    %63 = math.tanh %57 : vector<8x128xf32>
    %64 = arith.mulf %62, %63 : vector<8x128xf32>
    %c0_36 = arith.constant 0 : index
    %c0_37 = arith.constant 0 : index
    %65 = vector.load %arg12[%c0_36, %c0_37] : memref<16x8xf32, #tpu.memory_space<vmem>>, vector<16x8xf32>
    %cst_38 = arith.constant dense<0.000000e+00> : vector<16x128xf32>
    %66 = tpu.matmul %65, %64, %cst_38 {dimension_numbers = #tpu.dot_dimension_numbers<[1], [0], [0], [1], [0, 0, 1, 1], [], []>, precision = #tpu.contract_precision<fp32>} : vector<16x8xf32>, vector<8x128xf32>, vector<16x128xf32> -> vector<16x128xf32>
    %c0_39 = arith.constant 0 : index
    %c0_40 = arith.constant 0 : index
    %67 = vector.load %arg13[%c0_39, %c0_40] : memref<16x1xf32, #tpu.memory_space<vmem>>, vector<16x1xf32>
    %68 = vector.broadcast %67 : vector<16x1xf32> to vector<16x128xf32>
    %69 = arith.addf %66, %68 : vector<16x128xf32>
    %70 = vector.extract_strided_slice %69 {offsets = [0, 0], sizes = [8, 128], strides = [1, 1]} : vector<16x128xf32> to vector<8x128xf32>
    %71 = vector.extract_strided_slice %69 {offsets = [8, 0], sizes = [8, 128], strides = [1, 1]} : vector<16x128xf32> to vector<8x128xf32>
    %72 = arith.addf %1, %70 : vector<8x128xf32>
    %cst_41 = arith.constant 0.707106769 : f32
    %73 = vector.broadcast %cst_41 : f32 to vector<8x128xf32>
    %74 = arith.mulf %72, %73 : vector<8x128xf32>
    %c0_42 = arith.constant 0 : index
    %c0_43 = arith.constant 0 : index
    %c0_44 = arith.constant 0 : index
    %75 = vector.load %arg14[%c0_42, %c0_43, %c0_44] : memref<1x8x128xf32, #tpu.memory_space<vmem>>, vector<1x8x128xf32>
    %76 = vector.shape_cast %75 : vector<1x8x128xf32> to vector<8x128xf32>
    %77 = vector.shape_cast %74 : vector<8x128xf32> to vector<1x8x128xf32>
    tpu.vector_store %arg14[%c0_42, %c0_43, %c0_44], %77 {strides = array<i32>} : memref<1x8x128xf32, #tpu.memory_space<vmem>>, vector<1x8x128xf32>,
    %c0_45 = arith.constant 0 : index
    %c0_46 = arith.constant 0 : index
    %c0_47 = arith.constant 0 : index
    %78 = vector.load %arg15[%c0_45, %c0_46, %c0_47] : memref<1x8x128xf32, #tpu.memory_space<vmem>>, vector<1x8x128xf32>
    %79 = vector.shape_cast %78 : vector<1x8x128xf32> to vector<8x128xf32>
    %80 = vector.shape_cast %71 : vector<8x128xf32> to vector<1x8x128xf32>
    tpu.vector_store %arg15[%c0_45, %c0_46, %c0_47], %80 {strides = array<i32>} : memref<1x8x128xf32, #tpu.memory_space<vmem>>, vector<1x8x128xf32>,
    return
  }
  func.func @transform_0(%arg0: i32) -> (i32, i32, i32) {
    %c0_i32 = arith.constant 0 : i32
    %c0_i32_0 = arith.constant 0 : i32
    %c0_i32_1 = arith.constant 0 : i32
    return %arg0, %c0_i32, %c0_i32_0 : i32, i32, i32
  }
  func.func @transform_1(%arg0: i32) -> (i32, i32, i32) {
    %c0_i32 = arith.constant 0 : i32
    %c0_i32_0 = arith.constant 0 : i32
    %c0_i32_1 = arith.constant 0 : i32
    return %arg0, %c0_i32, %c0_i32_0 : i32, i32, i32
  }
  func.func @transform_2(%arg0: i32) -> (i32, i32, i32) {
    %c0_i32 = arith.constant 0 : i32
    %c0_i32_0 = arith.constant 0 : i32
    %c0_i32_1 = arith.constant 0 : i32
    return %arg0, %c0_i32, %c0_i32_0 : i32, i32, i32
  }
  func.func @transform_3(%arg0: i32) -> (i32, i32, i32) {
    %c0_i32 = arith.constant 0 : i32
    %c0_i32_0 = arith.constant 0 : i32
    %c0_i32_1 = arith.constant 0 : i32
    return %arg0, %c0_i32, %c0_i32_0 : i32, i32, i32
  }
  func.func @transform_4(%arg0: i32) -> (i32, i32, i32) {
    %c0_i32 = arith.constant 0 : i32
    %c0_i32_0 = arith.constant 0 : i32
    %c0_i32_1 = arith.constant 0 : i32
    return %arg0, %c0_i32, %c0_i32_0 : i32, i32, i32
  }
  func.func @transform_5(%arg0: i32) -> (i32, i32) {
    %c0_i32 = arith.constant 0 : i32
    %c0_i32_0 = arith.constant 0 : i32
    %c0_i32_1 = arith.constant 0 : i32
    return %c0_i32, %c0_i32_0 : i32, i32
  }
  func.func @transform_6(%arg0: i32) -> (i32, i32) {
    %c0_i32 = arith.constant 0 : i32
    %c0_i32_0 = arith.constant 0 : i32
    %c0_i32_1 = arith.constant 0 : i32
    return %c0_i32, %c0_i32_0 : i32, i32
  }
  func.func @transform_7(%arg0: i32) -> (i32, i32, i32) {
    %c0_i32 = arith.constant 0 : i32
    %c0_i32_0 = arith.constant 0 : i32
    %c0_i32_1 = arith.constant 0 : i32
    %c0_i32_2 = arith.constant 0 : i32
    return %c0_i32, %c0_i32_0, %c0_i32_1 : i32, i32, i32
  }
  func.func @transform_8(%arg0: i32) -> (i32, i32) {
    %c0_i32 = arith.constant 0 : i32
    %c0_i32_0 = arith.constant 0 : i32
    %c0_i32_1 = arith.constant 0 : i32
    return %c0_i32, %c0_i32_0 : i32, i32
  }
  func.func @transform_9(%arg0: i32) -> (i32, i32) {
    %c0_i32 = arith.constant 0 : i32
    %c0_i32_0 = arith.constant 0 : i32
    %c0_i32_1 = arith.constant 0 : i32
    return %c0_i32, %c0_i32_0 : i32, i32
  }
  func.func @transform_10(%arg0: i32) -> (i32, i32) {
    %c0_i32 = arith.constant 0 : i32
    %c0_i32_0 = arith.constant 0 : i32
    %c0_i32_1 = arith.constant 0 : i32
    return %c0_i32, %c0_i32_0 : i32, i32
  }
  func.func @transform_11(%arg0: i32) -> (i32, i32) {
    %c0_i32 = arith.constant 0 : i32
    %c0_i32_0 = arith.constant 0 : i32
    %c0_i32_1 = arith.constant 0 : i32
    return %c0_i32, %c0_i32_0 : i32, i32
  }
  func.func @transform_12(%arg0: i32) -> (i32, i32) {
    %c0_i32 = arith.constant 0 : i32
    %c0_i32_0 = arith.constant 0 : i32
    %c0_i32_1 = arith.constant 0 : i32
    return %c0_i32, %c0_i32_0 : i32, i32
  }
  func.func @transform_13(%arg0: i32) -> (i32, i32, i32) {
    %c0_i32 = arith.constant 0 : i32
    %c0_i32_0 = arith.constant 0 : i32
    %c0_i32_1 = arith.constant 0 : i32
    return %arg0, %c0_i32, %c0_i32_0 : i32, i32, i32
  }
  func.func @transform_14(%arg0: i32) -> (i32, i32, i32) {
    %c0_i32 = arith.constant 0 : i32
    %c0_i32_0 = arith.constant 0 : i32
    %c0_i32_1 = arith.constant 0 : i32
    return %arg0, %c0_i32, %c0_i32_0 : i32, i32, i32
  }
}

</mosaic_0001>

<bundles_post_ra>
// kernel: residual_block_forward.1
= control target key start
LH: loop header
LB: loop body
LE: loop exit
PB: predicated region body
PF: predicated region fallthrough
CT: control target
= control target key end

     0   :  { %s4211_s0 = inlined_call_operand.vmem [shape: f32[2,8,128], index: 0, kind: input, shape index: {}]   ;;  %s4212_s1 = inlined_call_operand.vmem [shape: f32[2,8,128], index: 1, kind: input, shape index: {}]   ;;  %s4213_s2 = inlined_call_operand.vmem [shape: f32[2,8,128], index: 2, kind: input, shape index: {}]   ;;  %s4214_s3 = inlined_call_operand.vmem [shape: f32[2,16,128], index: 3, kind: input, shape index: {}]   ;;  %s4215_s4 = inlined_call_operand.vmem [shape: f32[2,1,8], index: 4, kind: input, shape index: {}]   ;;  %s4216_s5 = inlined_call_operand.vmem [shape: f32[8,8], index: 5, kind: input, shape index: {}]   ;;  %s4217_s6 = inlined_call_operand.vmem [shape: f32[8,1], index: 6, kind: input, shape index: {}]   ;;  %s4218_s7 = inlined_call_operand.vmem [shape: f32[3,16,8], index: 7, kind: input, shape index: {}]   ;;  %s4219_s8 = inlined_call_operand.vmem [shape: f32[16,1], index: 8, kind: input, shape index: {}]   ;;  %s4220_s9 = inlined_call_operand.vmem [shape: f32[16,16], index: 9, kind: input, shape index: {}]   ;;  %s4221_s10 = inlined_call_operand.vmem [shape: f32[16,1], index: 10, kind: input, shape index: {}]   ;;  %s4222_s11 = inlined_call_operand.vmem [shape: f32[16,8], index: 11, kind: input, shape index: {}]   ;;  %s4223_s12 = inlined_call_operand.vmem [shape: f32[16,1], index: 12, kind: input, shape index: {}]   ;;  %s4224_s13 = inlined_call_operand.hbm [shape: f32[2,8,128], index: 13, kind: output, shape index: {0}]   ;;  %s4225_s14 = inlined_call_operand.hbm [shape: f32[2,8,128], index: 14, kind: output, shape index: {1}]  }
   0x1   :  { %4227 = sst [smem:[#allocation9_spill]] %s4211_s0 }
   0x2   :  { %4228 = sst [smem:[#allocation10_spill]] %s4212_s1 }
   0x3   :  { %4229 = sst [smem:[#allocation11_spill]] %s4213_s2 }
   0x4   :  { %4230 = sst [smem:[#allocation12_spill]] %s4215_s4 }
   0x5   :  { %4231 = sst [smem:[#allocation13_spill]] %s4216_s5 }
   0x6   :  { %4232 = sst [smem:[#allocation14_spill]] %s4217_s6 }
   0x7   :  { %20 = vsyncpa [#allocation3], 0 }
   0x8   :  { %22 = vsyncpa [#allocation3 + $0x1], 0 }
   0x9   :  { %23 = vsyncpa [#allocation5], 0 }
   0xa   :  { %25 = vsyncpa [#allocation5 + $0x1], 0  ;;  %s3812_s29 = smov 0   ;;  %s3814_s30 = smov 0  }
   0xb   :  { %s3816_s15 = smov 0   ;;  %s3818_s16 = smov 0  }
   0xc LB: > { %s3833_s17 = sadd.s32 4294967295, %s3731_s16   ;;  %s3303_s18 = sadd.s32 4294967294, %s3731_s16   ;;  %s3731_s16 = sphi %s3818_s16, %s4248_s16   ;;  %s3727_s15 = sphi %s3816_s15, %s4247_s15   ;;  %s3723_s30 = sphi %s3814_s30, %s4246_s30   ;;  %s3719_s29 = sphi %s3812_s29, %s4245_s29  }
   0xd   : > { %s3837_s19 = sadd.s32 1, %s3731_s16   ;;  %s336_s20 = sadd.s32 1, %s3727_s15 }
   0xe   : > { %s333_s21 = ssub.s32 %s3731_s16, %s3837_s19  ;;  %p346_p0 = scmp.ne.s32.totalorder %s3727_s15, %s3723_s30 }
   0xf   : > { %p334_p1 = scmp.eq.s32.totalorder %s333_s21, 0  ;;  %p347_p2 = scmp.eq.s32.totalorder %s3833_s17, 1 }
  0x10   : > { %p352_p3 = scmp.ne.s32.totalorder %s3723_s30, %s3719_s29  ;;  %p353_p4 = scmp.eq.s32.totalorder %s3303_s18, 1 }
  0x11   : > { %s3848_s22 = scalar_select %p334_p1, %s3727_s15, %s336_s20  }
  0x12   : > { %p3850_p5 = por %p347_p2, %p346_p0  ;;  %p3854_p6 = por %p353_p4, %p352_p3 }
  0x13   : > { %4233 = sst [smem:[#allocation8_spill]] %s3848_s22  ;;  %p3306_p7 = scmp.ge.s32.totalorder %s3731_s16, 1 }
  0x14   : > { %p456_p8 = scmp.lt.s32.totalorder %s3731_s16, 3 }
  0x16   : > { %p457_p9 = pnand %p3306_p7, %p456_p8 }
  0x17   : > { %p522_p10 = scmp.lt.s32.totalorder (!%p457_p9), %s3833_s17, 1  ;;  %s4236_s5 = sld [smem:[#allocation13_spill]] (!%p457_p9) }
  0x18   : > { %460 = sbr.rel (%p457_p9) target bundleno = 845 (0x34d), region = 72  ;;  %s4237_s4 = sld [smem:[#allocation12_spill]] (!%p457_p9) }
  0x19   : > { %s4238_s6 = sld [smem:[#allocation14_spill]] (!%p457_p9) }
  0x1a   : > { %s4239_s0 = sld [smem:[#allocation9_spill]] (!%p457_p9) }
  0x1b   : > { %s4240_s1 = sld [smem:[#allocation10_spill]] (!%p457_p9) }
  0x1c   : > { %s4241_s2 = sld [smem:[#allocation11_spill]] (!%p457_p9) }
  0x1d   : > { %s3862_s25 = scalar_select %p522_p10, %s3833_s17, 1  ;;  %v548_v0 = vld [vmem:[%s4236_s5] sm:$0xff]  ;;  %vm556_vm0 = vcmask 64512   ;;  %v3733_v4 = vmov 0   ;;  %v3317_v5 = vld [vmem:[%s4218_s7 + $0x10] sm:$0xff]  ;;  %v2092_v17 = vld [vmem:[%s4221_s10 + $0x8] sm:$0xff]  ;;  %v562_v23 = vlaneseq }
  0x1e   : > { %3633 = vset.pattern.permute.xlu0 %v3733_v4  ;;  %3634 = vset.pattern.permute.xlu1 %v3733_v4  ;;  %v586_v6 = vsel %vm556_vm0, %v3317_v5, 0  ;;  %v2091_v15 = vld [vmem:[%s4221_s10] sm:$0xff]  ;;  %v2076_v18 = vld [vmem:[%s4219_s8 + $0x8] sm:$0xff]  ;;  %v3318_v21 = vld [vmem:[%s4218_s7 + $0x18] sm:$0xff]  ;;  %v3734_v32 = vmov 0.0   ;;  %vm2103_vm3 = vcmask 130048  }
  0x1f   : > { %s541_s20 = scalar_lea.vmem %s4237_s4, %s3862_s25  ;;  %v3876_v7 = vand.u32 4294901760, %v586_v6  ;;  %v560_v9 = vld [vmem:[%s4238_s6] sm:$0xff]  ;;  %2095 = vperm.xlu1 %3634, %v2091_v15   ;;  %v2625_v20 = vld [vmem:[%s4223_s12 + $0x8] sm:$0xff]  ;;  %v589_v22 = vsel %vm556_vm0, %v3318_v21, 0  ;;  %v563_v25 = vand.u32 127, %v562_v23  ;;  %s3917_s4 = sshll.u32 %s3862_s25, 3 }
  0x20   : > { %v3314_v1 = vld [vmem:[%s541_s20] ss:$0 sm:$0xff]  ;;  %v3911_v24 = vand.u32 4294901760, %v589_v22  ;;  %v581_v28 = vld [vmem:[%s4218_s7 + $0x8] sm:$0xff]  ;;  %s525_s28 = scalar_lea.vmem %s4239_s0, %s3917_s4  ;;  %s4135_s20 = sand.u32 1, %s3723_s30  }
  0x21   : > { %v555_v2 = vmul.f32 %v3314_v1, %v548_v0  ;;  %v3879_v8 = vsub.f32 %v586_v6, %v3876_v7  ;;  %3432 = vmatprep.mubr.f32.mxu1 %v3876_v7  ;;  %v2075_v16 = vld [vmem:[%s4219_s8] sm:$0xff]  ;;  %vm564_vm1 = vcmp.ge.s32.totalorder %v563_v25, 2  ;;  %s529_s5 = scalar_lea.vmem %s4240_s1, %s3917_s4  ;;  %v1084_v31 = vsel %vm556_vm0, %v581_v28, 0  ;;  %v3320_v52 = vld [vmem:[%s4218_s7 + $0x28] sm:$0xff] }
  0x22   : > { %v2624_v19 = vld [vmem:[%s4223_s12] sm:$0xff]  ;;  %v3914_v26 = vsub.f32 %v589_v22, %v3911_v24  ;;  %v3315_v33 = vsel %vm564_vm1, 1.0, %v3734_v32  ;;  %v3943_v39 = vand.u32 4294901760, %v1084_v31  ;;  %vm567_vm2 = vcmp.lt.s32.totalorder %v563_v25, 126  ;;  %s533_s6 = scalar_lea.vmem %s4241_s2, %s3917_s4  ;;  %s3328_s4 = sshll.u32 %s3862_s25, 4 }
  0x23   : > { %v557_v3 = vsel %vm556_vm0, %v555_v2, 0.0  ;;  %v659_v10 = vand.u32 4294901760, %v3879_v8  ;;  %2079 = vperm.xlu1 %3634, %v2075_v16   ;;  %v580_v27 = vld [vmem:[%s4218_s7] sm:$0xff]  ;;  %v3316_v46 = vsel %vm567_vm2, 1.0, %v3734_v32  ;;  %v1582_v60 = vsel %vm556_vm0, %v3320_v52, 0  ;;  %s538_s26 = scalar_lea.vmem %s4214_s3, %s3328_s4  ;;  %s4226_s25 = sshll.u32 %s3833_s17, 7 }
  0x24   : > { %558 = vadd.xlane.f32.xlu0 %v557_v3  ;;  %v669_v29 = vand.u32 4294901760, %v3914_v26  ;;  %v1081_v30 = vsel %vm556_vm0, %v580_v27, 0  ;;  %v3936_v34 = vld [vmem:[%s525_s28] sm:$0xff]  ;;  %v3950_v47 = vsub.f32 %v1084_v31, %v3943_v39  ;;  %v3980_v3 = vand.u32 4294901760, %v1582_v60  ;;  %s4144_s22 = scalar_lea.hbm %s4225_s14, %s4226_s25  ;;  %s3141_s4 = scalar_lea.sflag [#allocation5], %s4135_s20 }
  0x25   : > { %v660_v12 = vsub.f32 %v3879_v8, %v659_v10  ;;  %v3938_v35 = vand.u32 4294901760, %v1081_v30  ;;  %v543_v38 = vld [vmem:[%s529_s5] sm:$0xff]  ;;  %s3307_s5 = sshll.u32 %s4135_s20, 3 }
  0x26   : > { %v670_v36 = vsub.f32 %v3914_v26, %v669_v29  ;;  %v3319_v50 = vld [vmem:[%s4218_s7 + $0x20] sm:$0xff]  ;;  %v1164_v57 = vand.u32 4294901760, %v3950_v47  ;;  %s521_s21 = scalar_lea.vmem [#allocation4], %s3307_s5  ;;  %s4148_s28 = scalar_lea.vmem [#allocation2], %s3307_s5 }
  0x27   : > { %v661_v14 = vand.u32 4294901760, %v660_v12  ;;  %2100 = vperm.xlu1 %3634, %v2092_v17   ;;  %v3947_v42 = vsub.f32 %v1081_v30, %v3938_v35  ;;  %v544_v56 = vld [vmem:[%s533_s6] sm:$0xff]  ;;  %v1579_v58 = vsel %vm556_vm0, %v3319_v50, 0  ;;  %v3992_v12 = vsub.f32 %v1582_v60, %v3980_v3  ;;  %s3735_s6 = smov [#allocation4]  }
  0x28   : > { %v671_v45 = vand.u32 4294901760, %v670_v36  ;;  %v3974_v1 = vand.u32 4294901760, %v1579_v58  ;;  %v1165_v2 = vsub.f32 %v3950_v47, %v1164_v57  ;;  %s3645_s27 = sshll.u32 %s3735_s6, 4  ;;  %s3646_s27 = int_to_ptr.vmem [resolvable:$false] %s3645_s27 }
  0x29   : > { %3427 = vmatprep.mubr.f32.mxu0 %v661_v14  ;;  %v1154_v51 = vand.u32 4294901760, %v3947_v42  ;;  %s3647_s25 = scalar_lea.vmem %s3646_s27, 256 }
  0x2b   : > { %2084 = vperm.xlu1 %3634, %v2076_v18   ;;  %v1155_v61 = vsub.f32 %v3947_v42, %v1154_v51  ;;  %v546_v18 = vld [vmem:[%s538_s26 + $0x8] sm:$0xff] }
  0x2c   : > { %v4025_v23 = vand.u32 4294901760, %v546_v18 }
  0x2d   : > { %v1156_v5 = vand.u32 4294901760, %v1155_v61 }
  0x2e   : > { %v2227_v31 = vsub.f32 %v546_v18, %v4025_v23 }
  0x2f   : > { %2628 = vperm.xlu1 %3634, %v2624_v19  }
  0x33   : > { %2633 = vperm.xlu1 %3634, %v2625_v20  }
  0xad   : > { %v559_v11 = vpop.xlane.xlu0 %558 }
  0xae   : > { %v561_v13 = vadd.f32 %v560_v9, %v559_v11  ;;  %v3987_v9 = vsub.f32 %v1579_v58, %v3974_v1  ;;  %v1166_v11 = vand.u32 4294901760, %v1165_v2 }
  0xb0   : > { %572 = vperm.xlu0 %3633, %v561_v13   ;;  %v2089_v13 = vld [vmem:[%s4220_s9] sm:$0xff]  ;;  %v1652_v16 = vand.u32 4294901760, %v3987_v9 }
  0xb1   : > { %v2105_v17 = vsel %vm2103_vm3, %v2089_v13, 0 }
  0xb2   : > { %v4013_v19 = vand.u32 4294901760, %v2105_v17  ;;  %v1653_v20 = vsub.f32 %v3987_v9, %v1652_v16 }
  0xb4   : > { %v4031_v25 = vsub.f32 %v2105_v17, %v4013_v19  ;;  %v1654_v27 = vand.u32 4294901760, %v1653_v20 }
  0xb6   : > { %v2179_v32 = vand.u32 4294901760, %v4031_v25 }
 0x12b   : > { %v573_v37 = vpop.permute.xlu0 %572 }
 0x12c   : > { %v575_v40 = vadd.f32 %v573_v37, %v3936_v34  ;;  %v576_v41 = vmul.f32 %v3315_v33, %v573_v37  ;;  %v578_v53 = vmul.f32 %v3316_v46, %v573_v37  ;;  %v2228_v37 = vand.u32 4294901760, %v2227_v31 }
 0x12e   : > { %v577_v43 = vadd.f32 %v576_v41, %v543_v38  ;;  %v622_v44 = vand.u32 4294901760, %v575_v40  ;;  %v579_v62 = vadd.f32 %v578_v53, %v544_v56 }
 0x130   : > { %v709_v48 = vsub.f32 %v575_v40, %v622_v44  ;;  %v3956_v49 = vand.u32 4294901760, %v577_v43  ;;  %3425 = vmatprep.subr.mxu0 %v622_v44  ;;  %v3983_v4 = vand.u32 4294901760, %v579_v62  ;;  %v2180_v40 = vsub.f32 %v4031_v25, %v2179_v32 }
 0x131   : > { %3426 = vmatpush3.msra.mxu0 %v622_v44 }
 0x132   : > { %v1204_v54 = vsub.f32 %v577_v43, %v3956_v49  ;;  %3428 = vmatmul.mubr.f32.vlgmr.msra.gmra.mxu0 %v671_v45  ;;  %3435 = vmatprep.subr.mxu0 %v709_v48  ;;  %v710_v55 = vand.u32 4294901760, %v709_v48  ;;  %v1702_v14 = vsub.f32 %v579_v62, %v3983_v4 }
 0x133   : > { %3436 = vmatpush3.msra.mxu0 %v709_v48  ;;  %3437 = vmatprep.mubr.f32.mxu0 %v3879_v8  ;;  %v1662_v8 = vand.u32 4294901760, %v3992_v12 }
 0x134   : > { %3445 = vmatprep.subr.mxu0 %v710_v55  ;;  %v711_v59 = vsub.f32 %v709_v48, %v710_v55  ;;  %v1205_v0 = vand.u32 4294901760, %v1204_v54  ;;  %v1703_v21 = vand.u32 4294901760, %v1702_v14  ;;  %v2622_v48 = vld [vmem:[%s4222_s11] sm:$0xff] }
 0x136   : > { %3438 = vmatmul.mubr.f32.vlgmr.msra.gmra.mxu0 %v3914_v26  ;;  %v712_v63 = vand.u32 4294901760, %v711_v59  ;;  %v1206_v6 = vsub.f32 %v1204_v54, %v1205_v0  ;;  %v1704_v28 = vsub.f32 %v1702_v14, %v1703_v21 }
 0x137   : > { %3446 = vmatpush3.msra.mxu0 %v710_v55  ;;  %3447 = vmatprep.mubr.f32.mxu0 %v3876_v7 }
 0x138   : > { %3455 = vmatprep.subr.mxu0 %v3956_v49  ;;  %3430 = vmatprep.subr.mxu1 %v712_v63  ;;  %v1207_v15 = vand.u32 4294901760, %v1206_v6  ;;  %v1705_v36 = vand.u32 4294901760, %v1704_v28 }
 0x139   : > { %3431 = vmatpush3.msra.mxu1 %v712_v63 }
 0x13a   : > { %3433 = vmatmul.mubr.f32.vlgmr.msra.gmra.mxu1 %v3911_v24  ;;  %3440 = vmatprep.subr.mxu1 %v622_v44 }
 0x13b   : > { %3448 = vmatmul.mubr.f32.vlgmr.msra.gmra.mxu0 %v3911_v24  ;;  %3441 = vmatpush3.msra.mxu1 %v622_v44 }
 0x13c   : > { %3456 = vmatpush3.msra.mxu0 %v3956_v49  ;;  %3450 = vmatprep.subr.mxu1 %v622_v44 }
 0x13d   : > { %3465 = vmatprep.subr.mxu0 %v1204_v54  ;;  %3442 = vmatprep.mubr.f32.mxu1 %v659_v10  ;;  %v2090_v10 = vld [vmem:[%s4220_s9 + $0x8] sm:$0xff] }
 0x13e   : > { %3457 = vmatprep.mubr.f32.mxu0 %v1156_v5  ;;  %3443 = vmatmul.mubr.f32.vlgmr.msra.gmra.mxu1 %v669_v29  ;;  %v2108_v22 = vsel %vm2103_vm3, %v2090_v10, 0 }
 0x13f   : > { %3451 = vmatpush3.msra.mxu1 %v622_v44  ;;  %3458 = vmatmul.mubr.f32.vlgmr.msra.gmra.mxu0 %v1166_v11  ;;  %v4033_v26 = vand.u32 4294901760, %v2108_v22 }
 0x140   : > { %3466 = vmatpush3.msra.mxu0 %v1204_v54  ;;  %3460 = vmatprep.subr.mxu1 %v1207_v15 }
 0x141   : > { %3475 = vmatprep.subr.mxu0 %v1205_v0  ;;  %3452 = vmatprep.mubr.f32.mxu1 %v3876_v7  ;;  %v1663_v7 = vsub.f32 %v3992_v12, %v1662_v8  ;;  %v4048_v33 = vsub.f32 %v2108_v22, %v4033_v26 }
 0x142   : > { %3467 = vmatprep.mubr.f32.mxu0 %v3947_v42  ;;  %3453 = vmatmul.mubr.f32.vlgmr.msra.gmra.mxu1 %v3911_v24  ;;  %v545_v24 = vld [vmem:[%s538_s26] sm:$0xff]  ;;  %v2229_v42 = vsub.f32 %v2227_v31, %v2228_v37  ;;  %s3167_s26 = sshll.u32 %s521_s21, 4  ;;  %s4146_s26 = int_to_ptr.vmem [resolvable:$true] %s3167_s26 }
 0x143   : > { %3461 = vmatpush3.msra.mxu1 %v1207_v15  ;;  %3468 = vmatmul.mubr.f32.vlgmr.msra.gmra.mxu0 %v3950_v47  ;;  %v1664_v29 = vand.u32 4294901760, %v1663_v7  ;;  %v4039_v30 = vand.u32 4294901760, %v545_v24  ;;  %v2189_v41 = vand.u32 4294901760, %v4048_v33  ;;  %s3641_s0 = scalar_lea.vmem %s4146_s26, 128  ;;  %p3648_p0 = scmp.lt.s32.totalorder %s4146_s26, %s3646_s27 }
 0x144   : > { %3476 = vmatpush3.msra.mxu0 %v1205_v0  ;;  %3470 = vmatprep.subr.mxu1 %v3956_v49  ;;  %p3642_p11 = scmp.ne.s32.totalorder %s4146_s26, %s3641_s0  ;;  %p3649_p1 = scmp.lt.s32.totalorder %s3647_s25, %s3641_s0 }
 0x145   : > { %3485 = vmatprep.subr.mxu0 %v3983_v4  ;;  %3462 = vmatprep.mubr.f32.mxu1 %v3938_v35  ;;  %v2234_v38 = vsub.f32 %v545_v24, %v4039_v30  ;;  %v2190_v44 = vsub.f32 %v4048_v33, %v2189_v41 }
 0x146   : > { %3477 = vmatprep.mubr.f32.mxu0 %v3938_v35  ;;  %3463 = vmatmul.mubr.f32.vlgmr.msra.gmra.mxu1 %v3943_v39  ;;  %p3643_p12 = pnand %p3642_p11, %p3850_p5  ;;  %p3650_p2 = por %p3649_p1, %p3648_p0 }
 0x147   : > { %3471 = vmatpush3.msra.mxu1 %v3956_v49  ;;  %3478 = vmatmul.mubr.f32.vlgmr.msra.gmra.mxu0 %v3943_v39  ;;  %v2235_v43 = vand.u32 4294901760, %v2234_v38  ;;  %v2191_v46 = vand.u32 4294901760, %v2190_v44 }
 0x148   : > { %3486 = vmatpush3.msra.mxu0 %v3983_v4  ;;  %3480 = vmatprep.subr.mxu1 %v3956_v49  ;;  %p3644_p13 = pneg %p3643_p12 }
 0x149   : > { %3495 = vmatprep.subr.mxu0 %v1702_v14  ;;  %3472 = vmatprep.mubr.f32.mxu1 %v1154_v51  ;;  %v2236_v45 = vsub.f32 %v2234_v38, %v2235_v43 }
 0x14a   : > { %3487 = vmatprep.mubr.f32.mxu0 %v1654_v27  ;;  %3473 = vmatmul.mubr.f32.vlgmr.msra.gmra.mxu1 %v1164_v57  ;;  %p3651_p3 = pnand %p3650_p2, %p3644_p13 }
 0x14b   : > { %3481 = vmatpush3.msra.mxu1 %v3956_v49  ;;  %3488 = vmatmul.mubr.f32.vlgmr.msra.gmra.mxu0 %v1664_v29  ;;  %v2237_v47 = vand.u32 4294901760, %v2236_v45  ;;  %v2637_v49 = vsel %vm556_vm0, %v2622_v48, 0 }
 0x14c   : > { %3496 = vmatpush3.msra.mxu0 %v1702_v14  ;;  %3490 = vmatprep.subr.mxu1 %v1705_v36  ;;  %v4103_v50 = vand.u32 4294901760, %v2637_v49 }
 0x14d   : > { %3505 = vmatprep.subr.mxu0 %v1703_v21  ;;  %3482 = vmatprep.mubr.f32.mxu1 %v3938_v35  ;;  %v2181_v35 = vand.u32 4294901760, %v2180_v40 }
 0x14e   : > { %3497 = vmatprep.mubr.f32.mxu0 %v3987_v9  ;;  %3483 = vmatmul.mubr.f32.vlgmr.msra.gmra.mxu1 %v3943_v39  ;;  %v2230_v39 = vand.u32 4294901760, %v2229_v42  ;;  %v4106_v51 = vsub.f32 %v2637_v49, %v4103_v50 }
 0x14f   : > { %3491 = vmatpush3.msra.mxu1 %v1705_v36  ;;  %3498 = vmatmul.mubr.f32.vlgmr.msra.gmra.mxu0 %v3992_v12 }
 0x150   : > { %3506 = vmatpush3.msra.mxu0 %v1703_v21  ;;  %3500 = vmatprep.subr.mxu1 %v3983_v4  ;;  %v2710_v52 = vand.u32 4294901760, %v4106_v51 }
 0x151   : > { %3492 = vmatprep.mubr.f32.mxu1 %v3974_v1  ;;  %3507 = vmatprep.mubr.f32.mxu0 %v3974_v1 }
 0x152   : > { %3493 = vmatmul.mubr.f32.vlgmr.msra.gmra.mxu1 %v3980_v3  ;;  %3515 = vmatprep.subr.mxu0 %v4025_v23  ;;  %v2711_v53 = vsub.f32 %v4106_v51, %v2710_v52 }
 0x153   : > { %3501 = vmatpush3.msra.mxu1 %v3983_v4  ;;  %3502 = vmatprep.mubr.f32.mxu1 %v1652_v16 }
 0x154   : > { %3510 = vmatprep.subr.mxu1 %v3983_v4  ;;  %3508 = vmatmul.mubr.f32.vlgmr.msra.gmra.mxu0 %v3980_v3  ;;  %v2712_v54 = vand.u32 4294901760, %v2711_v53 }
 0x155   : > { %3516 = vmatpush3.msra.mxu0 %v4025_v23  ;;  %3519 = vmatprep.mubr.f32.mxu0 %v2181_v35 }
 0x156   : > { %3503 = vmatmul.mubr.f32.vlgmr.msra.gmra.mxu1 %v1662_v8  ;;  %3517 = vmatprep.subr.mxu0 %v4039_v30 }
 0x157   : > { %3511 = vmatpush3.msra.mxu1 %v3983_v4  ;;  %3512 = vmatprep.mubr.f32.mxu1 %v3974_v1 }
 0x158   : > { %3518 = vmatpush3.msra.mxu0 %v4039_v30  ;;  %3522 = vmatprep.subr.mxu1 %v2230_v39 }
 0x159   : > { %3520 = vmatmul.mubr.f32.vlgmr.msra.gmra.mxu0 %v2191_v46  ;;  %3529 = vmatprep.subr.mxu0 %v2227_v31 }
 0x15a   : > { %3513 = vmatmul.mubr.f32.vlgmr.msra.gmra.mxu1 %v3980_v3  ;;  %3530 = vmatpush3.msra.mxu0 %v2227_v31 }
 0x15b   : > { %3523 = vmatpush3.msra.mxu1 %v2230_v39  ;;  %3531 = vmatprep.subr.mxu0 %v2234_v38 }
 0x15c   : > { %3524 = vmatprep.subr.mxu1 %v2237_v47  ;;  %3526 = vmatprep.mubr.f32.mxu1 %v4013_v19 }
 0x15d   : > { %3525 = vmatpush3.msra.mxu1 %v2237_v47  ;;  %3532 = vmatpush3.msra.mxu0 %v2234_v38 }
 0x15e   : > { %3533 = vmatprep.mubr.f32.mxu0 %v4031_v25  ;;  %3527 = vmatmul.mubr.f32.vlgmr.msra.gmra.mxu1 %v4033_v26 }
 0x15f   : > { %3534 = vmatmul.mubr.f32.vlgmr.msra.gmra.mxu0 %v4048_v33  ;;  %3536 = vmatprep.subr.mxu1 %v4025_v23 }
 0x160   : > { %3543 = vmatprep.subr.mxu0 %v2228_v37  ;;  %3537 = vmatpush3.msra.mxu1 %v4025_v23 }
 0x161   : > { %3544 = vmatpush3.msra.mxu0 %v2228_v37  ;;  %3538 = vmatprep.subr.mxu1 %v4039_v30  ;;  %v2096_v37 = vpop.permute.xlu1 %2095 }
 0x162   : > { %3545 = vmatprep.subr.mxu0 %v2235_v43  ;;  %3539 = vmatpush3.msra.mxu1 %v4039_v30 }
 0x163   : > { %3540 = vmatprep.mubr.f32.mxu1 %v2179_v32  ;;  %3546 = vmatpush3.msra.mxu0 %v2235_v43 }
 0x164   : > { %3547 = vmatprep.mubr.f32.mxu0 %v4013_v19  ;;  %3541 = vmatmul.mubr.f32.vlgmr.msra.gmra.mxu1 %v2189_v41 }
 0x165   : > { %3548 = vmatmul.mubr.f32.vlgmr.msra.gmra.mxu0 %v4033_v26  ;;  %3550 = vmatprep.subr.mxu1 %v4025_v23  ;;  %v2080_v48 = vpop.permute.xlu1 %2079 }
 0x166   : > { %3551 = vmatpush3.msra.mxu1 %v4025_v23  ;;  %3554 = vmatprep.mubr.f32.mxu1 %v4013_v19 }
 0x167   : > { %3552 = vmatprep.subr.mxu1 %v4039_v30  ;;  %3559 = vmatprep.mubr.f32.mxu0 %v2712_v54 }
 0x168   : > { %3553 = vmatpush3.msra.mxu1 %v4039_v30 }
 0x169   : > { %3555 = vmatmul.mubr.f32.vlgmr.msra.gmra.mxu1 %v4033_v26 }
 0x16a   : > { %3564 = vmatprep.mubr.f32.mxu1 %v4103_v50 }
 0x1f2   : > { %v3429_v55 = vpop.f32.mrf.mxu0 }
 0x1f4   : > { %v663_v56 = vpop.f32.mrf.mxu0 }
 0x1f6   : > { %v3439_v57 = vpop.f32.mrf.mxu0 }
 0x1f8   : > { %v829_v58 = vpop.f32.mrf.mxu0 }
 0x1fa   : > { %v3434_v59 = vpop.f32.mrf.mxu1 }
 0x1fb   : > { %v3449_v60 = vpop.f32.mrf.mxu0  ;;  %v756_v19 = vadd.f32 %v3434_v59, %v3429_v55 }
 0x1fc   : > { %v749_v61 = vpop.f32.mrf.mxu1 }
 0x1fd   : > { %v992_v62 = vpop.f32.mrf.mxu0  ;;  %v750_v63 = vadd.f32 %v749_v61, %v663_v56  ;;  %v837_v24 = vadd.f32 %v3439_v57, %v756_v19 }
 0x1fe   : > { %v3444_v0 = vpop.f32.mrf.mxu1 }
 0x1ff   : > { %v3459_v1 = vpop.f32.mrf.mxu0  ;;  %v830_v4 = vadd.f32 %v829_v58, %v750_v63  ;;  %v919_v30 = vadd.f32 %v3444_v0, %v837_v24  ;;  %v2101_v63 = vpop.permute.xlu1 %2100 }
 0x200   : > { %v910_v2 = vpop.f32.mrf.mxu1 }
 0x201   : > { %v1158_v3 = vpop.f32.mrf.mxu0  ;;  %v911_v12 = vadd.f32 %v910_v2, %v830_v4  ;;  %v999_v41 = vadd.f32 %v3449_v60, %v919_v30 }
 0x202   : > { %v3454_v5 = vpop.f32.mrf.mxu1 }
 0x203   : > { %v4113_v6 = vpop.f32.mrf.mxu0  ;;  %v993_v17 = vadd.f32 %v992_v62, %v911_v12  ;;  %v1077_v46 = vadd.f32 %v3454_v5, %v999_v41 }
 0x204   : > { %v1070_v9 = vpop.f32.mrf.mxu1 }
 0x205   : > { %v1324_v11 = vpop.f32.mrf.mxu0  ;;  %v1071_v21 = vadd.f32 %v1070_v9, %v993_v17  ;;  %v1169_v57 = vadd.f32 %v3459_v1, %v1077_v46 }
 0x206   : > { %v3464_v13 = vpop.f32.mrf.mxu1 }
 0x207   : > { %v4115_v14 = vpop.f32.mrf.mxu0  ;;  %v1159_v26 = vadd.f32 %v1158_v3, %v1071_v21  ;;  %v1251_v3 = vadd.f32 %v3464_v13, %v1169_v57 }
 0x208   : > { %v1244_v15 = vpop.f32.mrf.mxu1 }
 0x209   : > { %v1487_v16 = vpop.f32.mrf.mxu0  ;;  %v1245_v32 = vadd.f32 %v1244_v15, %v1159_v26  ;;  %v1332_v19 = vadd.f32 %v4113_v6, %v1251_v3 }
 0x20a   : > { %v4117_v8 = vpop.f32.mrf.mxu1 }
 0x20b   : > { %v3489_v10 = vpop.f32.mrf.mxu0  ;;  %v1325_v43 = vadd.f32 %v1324_v11, %v1245_v32  ;;  %v1414_v26 = vadd.f32 %v4117_v8, %v1332_v19  ;;  %v2623_v8 = vld [vmem:[%s4222_s11 + $0x8] sm:$0xff] }
 0x20c   : > { %v1405_v18 = vpop.f32.mrf.mxu1 }
 0x20d   : > { %v1656_v20 = vpop.f32.mrf.mxu0  ;;  %v1406_v47 = vadd.f32 %v1405_v18, %v1325_v43 }
 0x20e   : > { %v4119_v22 = vpop.f32.mrf.mxu1 }
 0x20f   : > { %v3499_v7 = vpop.f32.mrf.mxu0  ;;  %v1488_v61 = vadd.f32 %v1487_v16, %v1406_v47 }
 0x210   : > { %v1565_v23 = vpop.f32.mrf.mxu1 }
 0x211   : > { %v1822_v25 = vpop.f32.mrf.mxu0  ;;  %v1566_v5 = vadd.f32 %v1565_v23, %v1488_v61 }
 0x212   : > { %v3494_v27 = vpop.f32.mrf.mxu1 }
 0x213   : > { %v1749_v62 = vadd.f32 %v3494_v27, %v3489_v10 }
 0x214   : > { %v1742_v28 = vpop.f32.mrf.mxu1  ;;  %v3509_v29 = vpop.f32.mrf.mxu0 }
 0x215   : > { %v1743_v31 = vadd.f32 %v1742_v28, %v1656_v20  ;;  %v1830_v12 = vadd.f32 %v3499_v7, %v1749_v62  ;;  %v1494_v7 = vadd.f32 %v4115_v14, %v1414_v26 }
 0x216   : > { %v3504_v33 = vpop.f32.mrf.mxu1  ;;  %v1985_v36 = vpop.f32.mrf.mxu0 }
 0x217   : > { %v1823_v38 = vadd.f32 %v1822_v25, %v1743_v31  ;;  %v1912_v16 = vadd.f32 %v3504_v33, %v1830_v12  ;;  %v1572_v6 = vadd.f32 %v4119_v22, %v1494_v7  ;;  %v2085_v33 = vpop.permute.xlu1 %2084 }
 0x218   : > { %v1903_v40 = vpop.f32.mrf.mxu1 }
 0x219   : > { %v3521_v42 = vpop.f32.mrf.mxu0  ;;  %v1904_v39 = vadd.f32 %v1903_v40, %v1823_v38  ;;  %v1992_v28 = vadd.f32 %v3509_v29, %v1912_v16  ;;  %v2640_v29 = vsel %vm556_vm0, %v2623_v8, 0 }
 0x21a   : > { %v3514_v35 = vpop.f32.mrf.mxu1  ;;  %v2194_v4 = vadd.f32 %v3521_v42, %v2101_v63  ;;  %v2718_v14 = vand.u32 4294901760, %v2640_v29 }
 0x21b   : > { %v2183_v44 = vpop.f32.mrf.mxu0  ;;  %v1986_v55 = vadd.f32 %v1985_v36, %v1904_v39  ;;  %v2070_v31 = vadd.f32 %v3514_v35, %v1992_v28 }
 0x21c   : > { %v2063_v45 = vpop.f32.mrf.mxu1  ;;  %v2184_v53 = vadd.f32 %v2183_v44, %v2096_v37  ;;  %v2719_v43 = vsub.f32 %v2640_v29, %v2718_v14 }
 0x21d   : > { %v2064_v0 = vadd.f32 %v2063_v45, %v1986_v55  ;;  %v2074_v36 = vadd.f32 %v2070_v31, %v1572_v6  ;;  %v2629_v55 = vpop.permute.xlu1 %2628 }
 0x21e   : > { %v3528_v49 = vpop.f32.mrf.mxu1  ;;  %v2720_v35 = vand.u32 4294901760, %v2719_v43 }
 0x21f   : > { %v3535_v54 = vpop.f32.mrf.mxu0  ;;  %v2073_v17 = vadd.f32 %v2064_v0, %v1566_v5  ;;  %v2281_v1 = vadd.f32 %v3528_v49, %v2194_v4  ;;  %v2088_v38 = vadd.f32 %v2085_v33, %v2074_v36 }
 0x220   : > { %v2274_v56 = vpop.f32.mrf.mxu1  ;;  %v2721_v44 = vsub.f32 %v2719_v43, %v2720_v35 }
 0x221   : > { %v2275_v58 = vadd.f32 %v2274_v56, %v2184_v53  ;;  %v2356_v59 = vpop.f32.mrf.mxu0  ;;  %v2087_v24 = vadd.f32 %v2080_v48, %v2073_v17  ;;  %v2364_v13 = vadd.f32 %v3535_v54, %v2281_v1 }
 0x222   : > { %v2722_v47 = vand.u32 4294901760, %v2721_v44 }
 0x223   : > { %v2357_v60 = vadd.f32 %v2356_v59, %v2275_v58  ;;  %v2634_v59 = vpop.permute.xlu1 %2633 }
 0x224   : > { %v3542_v2 = vpop.f32.mrf.mxu1 }
 0x225   : > { %v3549_v9 = vpop.f32.mrf.mxu0  ;;  %v2447_v30 = vadd.f32 %v3542_v2, %v2364_v13 }
 0x226   : > { %v2438_v11 = vpop.f32.mrf.mxu1 }
 0x227   : > { %v2439_v15 = vadd.f32 %v2438_v11, %v2357_v60  ;;  %v2523_v18 = vpop.f32.mrf.mxu0  ;;  %v2530_v32 = vadd.f32 %v3549_v9, %v2447_v30 }
 0x229   : > { %v2524_v20 = vadd.f32 %v2523_v18, %v2439_v15  ;;  %v3556_v21 = vpop.f32.mrf.mxu1 }
 0x22a   : > { %v2609_v37 = vadd.f32 %v3556_v21, %v2530_v32 }
 0x22b   : > { %v2602_v10 = vpop.f32.mrf.mxu1 }
 0x22c   : > { %v2603_v25 = vadd.f32 %v2602_v10, %v2524_v20  ;;  %v2613_v40 = vadd.f32 %v2609_v37, %v2088_v38 }
 0x22e   : > { %v2612_v27 = vadd.f32 %v2603_v25, %v2087_v24 }
 0x230   : > { %v3321_v23 = vmul.f32 -1.442695, %v2612_v27 }
 0x232   : > { %3635 = vpow2.f32 %v3321_v23 }
 0x233   : > { %3637 = vtanh.f32 %v2613_v40 }
 0x23f   : > { %v3636_v41 = vpop.eup %3635 }
 0x240   : > { %v2617_v42 = vadd.f32 1.0, %v3636_v41  ;;  %v3638_v22 = vpop.eup %3637 }
 0x242   : > { %3639 = vrcp.f32 %v2617_v42 }
 0x24f   : > { %v3640_v39 = vpop.eup %3639 }
 0x250   : > { %v2621_v45 = vmul.f32 %v3640_v39, %v3638_v22 }
 0x252   : > { %v2673_v46 = vand.u32 4294901760, %v2621_v45 }
 0x254   : > { %3557 = vmatprep.subr.mxu0 %v2673_v46  ;;  %v2760_v48 = vsub.f32 %v2621_v45, %v2673_v46 }
 0x255   : > { %3558 = vmatpush3.msra.mxu0 %v2673_v46 }
 0x256   : > { %3560 = vmatmul.mubr.f32.vlgmr.msra.gmra.mxu0 %v2722_v47  ;;  %3567 = vmatprep.subr.mxu0 %v2760_v48  ;;  %v2761_v49 = vand.u32 4294901760, %v2760_v48 }
 0x257   : > { %3568 = vmatpush3.msra.mxu0 %v2760_v48  ;;  %3569 = vmatprep.mubr.f32.mxu0 %v4106_v51 }
 0x258   : > { %3577 = vmatprep.subr.mxu0 %v2761_v49  ;;  %v2762_v53 = vsub.f32 %v2760_v48, %v2761_v49 }
 0x25a   : > { %3570 = vmatmul.mubr.f32.vlgmr.msra.gmra.mxu0 %v2719_v43  ;;  %v2763_v54 = vand.u32 4294901760, %v2762_v53 }
 0x25b   : > { %3578 = vmatpush3.msra.mxu0 %v2761_v49  ;;  %3579 = vmatprep.mubr.f32.mxu0 %v4103_v50 }
 0x25c   : > { %3562 = vmatprep.subr.mxu1 %v2763_v54 }
 0x25d   : > { %3563 = vmatpush3.msra.mxu1 %v2763_v54 }
 0x25e   : > { %3565 = vmatmul.mubr.f32.vlgmr.msra.gmra.mxu1 %v2718_v14  ;;  %3572 = vmatprep.subr.mxu1 %v2673_v46 }
 0x25f   : > { %3573 = vmatpush3.msra.mxu1 %v2673_v46  ;;  %3574 = vmatprep.mubr.f32.mxu1 %v2710_v52 }
 0x260   : > { %3582 = vmatprep.subr.mxu1 %v2673_v46  ;;  %3580 = vmatmul.mubr.f32.vlgmr.msra.gmra.mxu0 %v2718_v14 }
 0x262   : > { %3575 = vmatmul.mubr.f32.vlgmr.msra.gmra.mxu1 %v2720_v35 }
 0x263   : > { %3583 = vmatpush3.msra.mxu1 %v2673_v46  ;;  %3584 = vmatprep.mubr.f32.mxu1 %v4103_v50 }
 0x266   : > { %3585 = vmatmul.mubr.f32.vlgmr.msra.gmra.mxu1 %v2718_v14 }
 0x316   : > { %v3561_v56 = vpop.f32.mrf.mxu0 }
 0x317   : > { %v2725_v61 = vadd.f32 %v3561_v56, %v2634_v59 }
 0x318   : > { %v2714_v57 = vpop.f32.mrf.mxu0 }
 0x319   : > { %v2715_v52 = vadd.f32 %v2714_v57, %v2629_v55 }
 0x31a   : > { %v3571_v58 = vpop.f32.mrf.mxu0 }
 0x31c   : > { %v2880_v51 = vpop.f32.mrf.mxu0 }
 0x31e   : > { %v3566_v62 = vpop.f32.mrf.mxu1 }
 0x31f   : > { %v2807_v60 = vadd.f32 %v3566_v62, %v2725_v61 }
 0x320   : > { %v2800_v63 = vpop.f32.mrf.mxu1  ;;  %v3581_v3 = vpop.f32.mrf.mxu0 }
 0x321   : > { %v2801_v0 = vadd.f32 %v2800_v63, %v2715_v52  ;;  %v2888_v50 = vadd.f32 %v3571_v58, %v2807_v60 }
 0x322   : > { %v3576_v2 = vpop.f32.mrf.mxu1  ;;  %v3043_v15 = vpop.f32.mrf.mxu0 }
 0x323   : > { %v2881_v4 = vadd.f32 %v2880_v51, %v2801_v0  ;;  %v2970_v9 = vadd.f32 %v3576_v2, %v2888_v50 }
 0x324   : > { %v2961_v5 = vpop.f32.mrf.mxu1 }
 0x325   : > { %v2962_v11 = vadd.f32 %v2961_v5, %v2881_v4  ;;  %v3050_v12 = vadd.f32 %v3581_v3, %v2970_v9 }
 0x326   : > { %v3586_v17 = vpop.f32.mrf.mxu1 }
 0x327   : > { %v3044_v18 = vadd.f32 %v3043_v15, %v2962_v11  ;;  %v3128_v19 = vadd.f32 %v3586_v17, %v3050_v12 }
 0x328   : > { %v3121_v1 = vpop.f32.mrf.mxu1 }
 0x329   : > { %3134 = vst [vmem:[%s521_s21] sm:$0xff] %v3128_v19  ;;  %v3122_v20 = vadd.f32 %v3121_v1, %v3044_v18 }
 0x32a   : > { %3654 = shalt.err (!%p3651_p3)
}
 0x32b   : > { %s3655_s5 = scalar_lea.hbm %s4144_s22, 128  ;;  %s3659_s6 = scalar_lea.hbm %s4225_s14, 256 }
 0x32c   : > { %p3656_p4 = scmp.ne.s32.totalorder %s4144_s22, %s3655_s5  ;;  %p3660_p9 = scmp.lt.s32.totalorder %s4144_s22, %s4225_s14 }
 0x32d   : > { %p3661_p10 = scmp.lt.s32.totalorder %s3659_s6, %s3655_s5 }
 0x32e   : > { %p3657_p7 = pnand %p3656_p4, %p3850_p5 }
 0x32f   : > { %p3662_p11 = por %p3661_p10, %p3660_p9 }
 0x330   : > { %p3658_p8 = pneg %p3657_p7 }
 0x332   : > { %p3663_p12 = pnand %p3662_p11, %p3658_p8 }
 0x334   : > { %3666 = shalt.err (!%p3663_p12)
}
 0x335   : > { %3588 = dma.vmem_to_hbm [thread:$0]  (%p3850_p5), %s4146_s26, 128, %s4144_s22, %s3141_s4   ;;  %v3131_v21 = vadd.f32 %v3122_v20, %v3936_v34 }
 0x336   : > { %s4242_s0 = sshll.u32 %s3833_s17, 7  ;;  %s4243_s18 = sshll.u32 %s4148_s28, 4  ;;  %s3155_s18 = int_to_ptr.vmem [resolvable:$true] %s4243_s18 }
 0x337   : > { %v3132_v16 = vmul.f32 0.70710677, %v3131_v21  ;;  %s3152_s25 = scalar_lea.hbm %s4224_s13, %s4242_s0  ;;  %s3136_s27 = scalar_lea.sflag [#allocation3], %s4135_s20 }
 0x338   : > { %s3667_s5 = scalar_lea.vmem %s3155_s18, 128  ;;  %s3736_s21 = smov [#allocation2]  }
 0x339   : > { %3133 = vst [vmem:[%s4148_s28] sm:$0xff] %v3132_v16  ;;  %p3668_p13 = scmp.ne.s32.totalorder %s3155_s18, %s3667_s5  ;;  %s3671_s6 = sshll.u32 %s3736_s21, 4  ;;  %s3672_s6 = int_to_ptr.vmem [resolvable:$false] %s3671_s6 }
 0x33a   : > { %s3673_s26 = scalar_lea.vmem %s3672_s6, 256  ;;  %p3674_p2 = scmp.lt.s32.totalorder %s3155_s18, %s3672_s6 }
 0x33b   : > { %p3669_p0 = pnand %p3668_p13, %p3850_p5  ;;  %p3675_p3 = scmp.lt.s32.totalorder %s3673_s26, %s3667_s5 }
 0x33d   : > { %p3670_p1 = pneg %p3669_p0  ;;  %p3676_p4 = por %p3675_p3, %p3674_p2 }
 0x33f   : > { %p3677_p7 = pnand %p3676_p4, %p3670_p1 }
 0x341   : > { %3680 = shalt.err (!%p3677_p7)
}
 0x342   : > { %s3681_s17 = scalar_lea.hbm %s3152_s25, 128  ;;  %s3685_s28 = scalar_lea.hbm %s4224_s13, 256 }
 0x343   : > { %p3682_p8 = scmp.ne.s32.totalorder %s3152_s25, %s3681_s17  ;;  %p3686_p11 = scmp.lt.s32.totalorder %s3152_s25, %s4224_s13 }
 0x344   : > { %p3687_p12 = scmp.lt.s32.totalorder %s3685_s28, %s3681_s17 }
 0x345   : > { %p3683_p9 = pnand %p3682_p8, %p3850_p5 }
 0x346   : > { %p3688_p13 = por %p3687_p12, %p3686_p11 }
 0x347   : > { %p3684_p10 = pneg %p3683_p9 }
 0x349   : > { %p3689_p0 = pnand %p3688_p13, %p3684_p10 }
 0x34b   : > { %3692 = shalt.err (!%p3689_p0)
}
 0x34c   : > { %3587 = dma.vmem_to_hbm [thread:$0]  (%p3850_p5), %s3155_s18, 128, %s3152_s25, %s3136_s27  }
 0x34d PF: > { %p3598_p1 = scmp.ge.s32.totalorder %s3731_s16, 2  ;;  %s3179_s1 = sand.u32 1, %s3719_s29  }
 0x34e   : > { %s3180_s2 = scalar_lea.sflag [#allocation3], %s3179_s1 }
 0x34f   : > { %p3592_p2 = pnand %p3598_p1, %p3854_p6 }
 0x351   : > { %p3593_p3 = pneg %p3592_p2 }
 0x353   : > { %3710 = dma.done.wait (%p3593_p3), %s3180_s2, 128  }
 0x354   : > { %3712 = vsyncadd (%p3593_p3), %s3180_s2, 4294967168  ;;  %s3189_s5 = scalar_lea.sflag [#allocation5], %s3179_s1 }
 0x355   : > { %3714 = dma.done.wait (%p3593_p3), %s3189_s5, 128  }
 0x356   : > { %3716 = vsyncadd (%p3593_p3), %s3189_s5, 4294967168  ;;  %s4244_s23 = sld [smem:[#allocation8_spill]]  ;;  %p28_p5 = scmp.ge.s32.totalorder %s3837_s19, 4  }
 0x357   : > { %s4245_s29 = smov %s3723_s30  ;;  %s4246_s30 = smov %s3727_s15 }
 0x358   : > { %s4248_s16 = smov %s3837_s19  ;;  %30 = sbr.rel (!%p28_p5) target bundleno = 12 (0xc), region = 138 }
 0x35c   : > { %s4247_s15 = smov %s4244_s23 }
 0x35d   :  { %3194 = vsyncpa [#allocation3], 1 }
 0x35e   :  { %3196 = vsyncpa [#allocation3 + $0x1], 1 }
 0x35f   :  { %3197 = vsyncpa [#allocation5], 1 }
 0x360   :  { %3199 = vsyncpa [#allocation5 + $0x1], 1 }

</bundles_post_ra>
